<compile_context>
chip_gen: v6e
topology: v6e:2x2x1
jax: 0.10.0
libtpu: 0.0.40
codegen_flags: <defaults>
</compile_context>

<pallas_src>
import jax
import jax.numpy as jnp
from jax.experimental import pallas as pl
from jax.experimental.pallas import tpu as pltpu


# ----------------------------- Pallas kernel -----------------------------

def _copy_kernel(x_ref, o_ref):
    o_ref[...] = x_ref[...]


# ----------------------------- helpers -----------------------------

_TARGET_BLOCK_BYTES = 2 * 1024 * 1024   # ~2 MiB blocks: near-roofline on
                                        # v5e/v6e/v7x, safe for all VMEM limits.
_MAX_LANE_MULT = 32                     # cap `last` at 32 * 128 = 4096 lanes.


def _sublane_multiple(itemsize: int) -> int:
    # Native sublane tiling: (8,128) f32, (16,128) bf16/fp16, (32,128) int8/fp8.
    return {4: 8, 2: 16, 1: 32}.get(itemsize, 8)


def _pick_lane_width(total: int, ndim: int, last_dim: int) -> int:
    """Lane-dense width for the flattened 2-D slab."""
    if total % 128 == 0:
        m = total // 128
        best = 1
        for d in range(1, min(m, _MAX_LANE_MULT) + 1):
            if m % d == 0:
                best = d
        return 128 * best
    # Odd element counts: keep the original last dim as the (full-extent) lane
    # axis so the BlockSpec stays legal.  Only the (rare) <128-lane case pays
    # masked stores.
    return last_dim if ndim >= 1 else 1


def _pick_row_tile(rows: int, last: int, itemsize: int) -> int:
    """Fixed row tile targeting ~2 MiB blocks; edge block handled by cdiv."""
    sublane = _sublane_multiple(itemsize)
    row_bytes = max(1, last * itemsize)
    tile = (_TARGET_BLOCK_BYTES // row_bytes) // sublane * sublane
    tile = max(sublane, tile)
    if rows <= tile:
        # Full extent on the row axis is always a legal block shape.
        return rows
    return tile


# ----------------------------- wrapper -----------------------------

def unsqueeze(x, dim):
    """Pallas equivalent of torch.Tensor.unsqueeze(dim)."""
    x = jnp.asarray(x)
    ndim = x.ndim
    # PyTorch semantics: dim may be in [-(ndim+1), ndim].
    if dim < 0:
        dim = dim + ndim + 1
    assert 0 <= dim <= ndim, f"dim {dim} out of range for rank {ndim}"
    out_shape = x.shape[:dim] + (1,) + x.shape[dim:]

    if x.size == 0:
        # Nothing to copy; pure metadata change.
        return x.reshape(out_shape)

    total = int(x.size)
    itemsize = jnp.dtype(x.dtype).itemsize

    last = _pick_lane_width(total, ndim, x.shape[-1] if ndim >= 1 else 1)
    rows = total // last
    x2 = x.reshape(rows, last)

    tile = _pick_row_tile(rows, last, itemsize)
    grid = (pl.cdiv(rows, tile),)

    # Alias input->output (no second HBM buffer) only when the staged 2-D view
    # is a fresh buffer, so a caller-visible array is never donated.
    aliases = {} if x2 is x else {0: 0}

    y2 = pl.pallas_call(
        _copy_kernel,
        out_shape=jax.ShapeDtypeStruct((rows, last), x.dtype),
        grid=grid,
        in_specs=[pl.BlockSpec((tile, last), lambda i: (i, 0))],
        out_specs=pl.BlockSpec((tile, last), lambda i: (i, 0)),
        compiler_params=pltpu.CompilerParams(
            dimension_semantics=("parallel",)),
        cost_estimate=pl.CostEstimate(
            flops=0, transcendentals=0,
            bytes_accessed=2 * total * itemsize),
        input_output_aliases=aliases,
    )(x2)

    # Insert the size-1 axis as a metadata-only reshape (layout unchanged).
    return y2.reshape(out_shape)


class Unsqueeze:
    """Mirror of the PyTorch module interface."""

    def __init__(self, dim):
        self.dim = dim

    def __call__(self, x):
        return unsqueeze(x, self.dim)


# ----------------------------- smoke test -----------------------------

if __name__ == "__main__":
    key = jax.random.PRNGKey(0)
    x = jax.random.normal(key, (2, 4, 16, 16), jnp.float32)

    # Positive dim (typical usage).
    out = jax.block_until_ready(Unsqueeze(1)(x))
    assert out.shape == (2, 1, 4, 16, 16), out.shape
    assert bool(jnp.array_equal(out, jnp.expand_dims(x, 1)))

    # Negative dim (PyTorch allows dim in [-(ndim+1), ndim]).
    out_neg = jax.block_until_ready(Unsqueeze(-1)(x))
    assert out_neg.shape == (2, 4, 16, 16, 1), out_neg.shape
    assert bool(jnp.array_equal(out_neg, jnp.expand_dims(x, -1)))

    # bf16 path (dtype-aware sublane tiling).
    xb = x.astype(jnp.bfloat16)
    out_b = jax.block_until_ready(Unsqueeze(0)(xb))
    assert out_b.shape == (1, 2, 4, 16, 16), out_b.shape
    assert bool(jnp.array_equal(out_b, jnp.expand_dims(xb, 0)))

    # Multi-block grid with a masked edge block (rows not divisible by tile).
    xl = jax.random.normal(jax.random.PRNGKey(1), (64, 96, 128), jnp.float32)
    out_l = jax.block_until_ready(Unsqueeze(2)(xl))
    assert out_l.shape == (64, 96, 1, 128), out_l.shape
    assert bool(jnp.array_equal(out_l, jnp.expand_dims(xl, 2)))

    # Element count not divisible by 128 (full-extent lane fallback).
    xs = jax.random.normal(jax.random.PRNGKey(2), (3, 5, 7), jnp.float32)
    out_s = jax.block_until_ready(Unsqueeze(-2)(xs))
    assert out_s.shape == (3, 5, 1, 7), out_s.shape
    assert bool(jnp.array_equal(out_s, jnp.expand_dims(xs, -2)))

    assert bool(jnp.all(jnp.isfinite(out)))
    print("KERNEL_OK")
</pallas_src>

<mosaic_0001>
module attributes {stable_mosaic.version = 11 : i64} {
  func.func @_copy_kernel(%arg0: i32, %arg1: memref<1x2048xf32, #tpu.memory_space<vmem>>, %arg2: memref<1x2048xf32, #tpu.memory_space<vmem>>) attributes {dimension_semantics = [#tpu.dimension_semantics<parallel>], iteration_bounds = array<i64: 1>, scalar_prefetch = 0 : i64, scratch_operands = 0 : i64, tpu.core_type = #tpu.core_type<tc>, window_params = [{transform_indices = @transform_0, window_bounds = array<i64: 1, 2048>}, {transform_indices = @transform_1, window_bounds = array<i64: 1, 2048>}]} {
    %c0 = arith.constant 0 : index
    %c0_0 = arith.constant 0 : index
    %0 = vector.load %arg1[%c0, %c0_0] : memref<1x2048xf32, #tpu.memory_space<vmem>>, vector<1x2048xf32>
    %c0_1 = arith.constant 0 : index
    %c0_2 = arith.constant 0 : index
    %1 = vector.load %arg2[%c0_1, %c0_2] : memref<1x2048xf32, #tpu.memory_space<vmem>>, vector<1x2048xf32>
    tpu.vector_store %arg2[%c0_1, %c0_2], %0 {strides = array<i32>} : memref<1x2048xf32, #tpu.memory_space<vmem>>, vector<1x2048xf32>,
    return
  }
  func.func @transform_0(%arg0: i32) -> (i32, i32) {
    %c0_i32 = arith.constant 0 : i32
    %c0_i32_0 = arith.constant 0 : i32
    return %arg0, %c0_i32 : i32, i32
  }
  func.func @transform_1(%arg0: i32) -> (i32, i32) {
    %c0_i32 = arith.constant 0 : i32
    %c0_i32_0 = arith.constant 0 : i32
    return %arg0, %c0_i32 : i32, i32
  }
}

</mosaic_0001>

<bundles_post_ra>
// kernel: tpu_custom_call.1
= control target key start
LH: loop header
LB: loop body
LE: loop exit
PB: predicated region body
PF: predicated region fallthrough
CT: control target
= control target key end

     0   :  { %6 = vsyncpa [#allocation3], 0  ;;  %s104_s0 = inlined_call_operand.hbm [shape: f32[1,2048], index: 0, kind: input, shape index: {}, may-alias: {0,1}]   ;;  %s105_s1 = inlined_call_operand.hbm [shape: f32[1,2048], index: 1, kind: output, shape index: {}, may-alias: {0,1}]  }
   0x1   :  { %7 = vsyncpa [#allocation4], 0  ;;  %s86_s6 = smov [#allocation2]  }
   0x2   :  { %s14_s7 = sshll.u32 %s86_s6, 4  ;;  %s15_s7 = int_to_ptr.vmem [resolvable:$true] %s14_s7 }
   0x3   :  { %s50_s8 = scalar_lea.vmem %s15_s7, 256  ;;  %p55_p1 = scmp.lt.s32.totalorder %s15_s7, %s15_s7 }
   0x4   :  { %p51_p0 = scmp.ne.s32.totalorder %s15_s7, %s50_s8  ;;  %p56_p2 = scmp.lt.s32.totalorder %s50_s8, %s50_s8 }
   0x6   :  { %p57_p3 = por %p56_p2, %p55_p1 }
   0x8   :  { %p58_p4 = pnand %p57_p3, %p51_p0 }
   0xa   :  { %61 = shalt.err (!%p58_p4)
}
   0xb   :  { %17 = dma.hbm_to_vmem [thread:$0]  %s104_s0, 256, %s15_s7, [#allocation3]  }
   0xc   :  { %82 = dma.done.wait [#allocation3], 256  }
   0xd   :  { %83 = vsyncadd [#allocation3], 4294967040  ;;  %s87_s11 = smov [#allocation5]   ;;  %v21_v0 = vld [vmem:[#allocation2] sm:$0xff]  ;;  %v22_v1 = vld [vmem:[#allocation2 + $0x8] sm:$0xff] }
   0xe   :  { %s31_s12 = sshll.u32 %s87_s11, 4  ;;  %23 = vst [vmem:[#allocation5] sm:$0xff] %v21_v0  ;;  %24 = vst [vmem:[#allocation5 + $0x8] sm:$0xff] %v22_v1  ;;  %s32_s12 = int_to_ptr.vmem [resolvable:$true] %s31_s12 }
   0xf   :  { %s62_s13 = scalar_lea.vmem %s32_s12, 256  ;;  %p67_p6 = scmp.lt.s32.totalorder %s32_s12, %s32_s12 }
  0x10   :  { %p63_p5 = scmp.ne.s32.totalorder %s32_s12, %s62_s13  ;;  %p68_p7 = scmp.lt.s32.totalorder %s62_s13, %s62_s13 }
  0x12   :  { %p69_p8 = por %p68_p7, %p67_p6 }
  0x14   :  { %p70_p9 = pnand %p69_p8, %p63_p5 }
  0x16   :  { %73 = shalt.err (!%p70_p9)
}
  0x17   :  { %34 = dma.vmem_to_hbm [thread:$0]  %s32_s12, 256, %s105_s1, [#allocation4]  }
  0x18   :  { %84 = dma.done.wait [#allocation4], 256  }
  0x19   :  { %85 = vsyncadd [#allocation4], 4294967040 }
  0x1a   :  { %38 = vsyncpa [#allocation3], 1 }
  0x1b   :  { %39 = vsyncpa [#allocation4], 1 }

</bundles_post_ra>
